<compile_context>
chip_gen: v7x
topology: tpu7x:2x2x1
jax: 0.10.0
libtpu: 0.0.40
codegen_flags: <defaults>
</compile_context>

<pallas_src>
import functools

import jax
import jax.numpy as jnp
from jax import lax
from jax.experimental import pallas as pl
from jax.experimental.pallas import tpu as pltpu


def _round_up(v: int, m: int) -> int:
    return ((v + m - 1) // m) * m


def mlp_block_kernel(x_ref, wt_ref, b_ref, o_ref, *, depth, compute_dtype, unroll_depth):
    """One batch tile through all `depth` fused Linear+ReLU layers.

    x_ref  : (TB, Hp)          activation tile (input dtype)
    wt_ref : (depth, Hp, Hp)   pre-transposed weights (in, out), compute_dtype
    b_ref  : (depth, Hp)       biases, f32
    o_ref  : (TB, Hp)          output tile
    """
    h = x_ref[...].astype(compute_dtype)

    def layer(i, h):
        w = wt_ref[i]                               # (Hp, Hp), compute_dtype
        b = b_ref[pl.ds(i, 1), :]                   # (1, Hp), f32
        y = jnp.dot(h, w, preferred_element_type=jnp.float32) + b
        return jnp.maximum(y, 0.0).astype(compute_dtype)

    if depth <= unroll_depth:
        # Small static depth: unroll for LLO scheduling visibility.
        for i in range(depth):
            h = layer(i, h)
    else:
        # Large depth: loop boundary keeps only one layer's intermediates live.
        h = lax.fori_loop(0, depth, layer, h)

    o_ref[...] = h.astype(o_ref.dtype)


def mlp_block(x, weights, biases, *, compute_dtype=jnp.bfloat16,
              batch_tile=512, unroll_depth=4):
    """x: (B, H); weights: (depth, H_out, H_in) [PyTorch Linear layout]; biases: (depth, H)."""
    depth, h_out, h_in = weights.shape
    assert h_out == h_in, "MLP_Block uses square Linear(H, H) layers"
    B, H = x.shape
    assert H == h_in

    # Lane-dense hidden dim; sublane-aligned batch tile.
    Hp = _round_up(H, 128)
    TB = min(_round_up(B, 8), batch_tile)
    Bp = _round_up(B, TB)
    n_tiles = Bp // TB

    # Wrapper-side layout prep (plain JAX): transpose to (depth, in, out),
    # zero-pad hidden dim (exact through Linear+ReLU), cast weights to compute dtype.
    wt = jnp.transpose(weights, (0, 2, 1))  # (depth, in, out)
    wtp = jnp.zeros((depth, Hp, Hp), compute_dtype).at[:, :H, :H].set(
        wt.astype(compute_dtype))
    bp = jnp.zeros((depth, Hp), jnp.float32).at[:, :H].set(biases.astype(jnp.float32))
    xp = jnp.zeros((Bp, Hp), x.dtype).at[:B, :H].set(x)

    out_bytes = Bp * Hp * jnp.dtype(x.dtype).itemsize
    vmem_need = (wtp.size * jnp.dtype(compute_dtype).itemsize
                 + bp.size * 4
                 + 4 * TB * Hp * 4          # double-buffered in + out tiles (f32 worst case)
                 + (8 << 20))               # headroom
    vmem_limit = int(min(max(vmem_need, 32 << 20), 64 << 20))

    kernel = functools.partial(
        mlp_block_kernel, depth=depth, compute_dtype=compute_dtype,
        unroll_depth=unroll_depth)

    out = pl.pallas_call(
        kernel,
        out_shape=jax.ShapeDtypeStruct((Bp, Hp), x.dtype),
        grid_spec=pl.GridSpec(
            grid=(n_tiles,),
            in_specs=[
                pl.BlockSpec((TB, Hp), lambda i: (i, 0)),            # activations: pipelined
                pl.BlockSpec((depth, Hp, Hp), lambda i: (0, 0, 0)),  # weights: VMEM-resident
                pl.BlockSpec((depth, Hp), lambda i: (0, 0)),         # biases: VMEM-resident
            ],
            out_specs=pl.BlockSpec((TB, Hp), lambda i: (i, 0)),
        ),
        compiler_params=pltpu.CompilerParams(
            dimension_semantics=("parallel",),
            vmem_limit_bytes=vmem_limit,
        ),
        cost_estimate=pl.CostEstimate(
            flops=2 * depth * Bp * Hp * Hp,
            transcendentals=0,
            bytes_accessed=int(xp.size * jnp.dtype(x.dtype).itemsize
                               + wtp.size * jnp.dtype(compute_dtype).itemsize
                               + bp.size * 4 + out_bytes),
        ),
    )(xp, wtp, bp)

    return out[:B, :H]


def reference_mlp_block(x, weights, biases):
    h = x.astype(jnp.float32)
    for i in range(weights.shape[0]):
        h = jnp.maximum(h @ weights[i].T + biases[i], 0.0)
    return h.astype(x.dtype)


if __name__ == "__main__":
    hidden_size = 32
    depth = 3
    batch = 8

    key = jax.random.PRNGKey(0)
    kx, kw, kb = jax.random.split(key, 3)

    x = jax.random.normal(kx, (batch, hidden_size), dtype=jnp.float32)
    # Deterministic init mimicking nn.Linear's uniform(-1/sqrt(fan_in), 1/sqrt(fan_in)).
    bound = 1.0 / jnp.sqrt(jnp.float32(hidden_size))
    weights = jax.random.uniform(
        kw, (depth, hidden_size, hidden_size), dtype=jnp.float32,
        minval=-bound, maxval=bound)
    biases = jax.random.uniform(
        kb, (depth, hidden_size), dtype=jnp.float32, minval=-bound, maxval=bound)

    ref = reference_mlp_block(x, weights, biases)

    # 1) Exact-semantics path: f32 matmul, unrolled layers.
    out_f32 = jax.block_until_ready(
        mlp_block(x, weights, biases, compute_dtype=jnp.float32))
    assert out_f32.shape == (batch, hidden_size)
    assert jnp.allclose(out_f32, ref, atol=1e-5, rtol=1e-5), "f32 path mismatch vs reference"

    # 2) Default fast path: bf16 MXU inputs, f32 accumulation.
    out_bf16 = jax.block_until_ready(mlp_block(x, weights, biases))
    assert out_bf16.shape == (batch, hidden_size)
    assert jnp.allclose(out_bf16, ref, atol=6e-2, rtol=6e-2), "bf16 path mismatch vs reference"

    # 3) Deeper block exercising the lax.fori_loop layer loop (dynamic weight index).
    depth2 = 6
    kw2, kb2 = jax.random.split(jax.random.PRNGKey(1))
    weights2 = jax.random.uniform(
        kw2, (depth2, hidden_size, hidden_size), dtype=jnp.float32,
        minval=-bound, maxval=bound)
    biases2 = jax.random.uniform(
        kb2, (depth2, hidden_size), dtype=jnp.float32, minval=-bound, maxval=bound)
    ref2 = reference_mlp_block(x, weights2, biases2)
    out2 = jax.block_until_ready(
        mlp_block(x, weights2, biases2, compute_dtype=jnp.float32))
    assert jnp.allclose(out2, ref2, atol=1e-5, rtol=1e-5), "fori_loop path mismatch"

    print("KERNEL_OK")
</pallas_src>

<mosaic_0001>
module attributes {stable_mosaic.version = 11 : i64} {
  func.func @mlp_block_kernel(%arg0: i32, %arg1: memref<8x128xf32, #tpu.memory_space<vmem>>, %arg2: memref<3x128x128xf32, #tpu.memory_space<vmem>>, %arg3: memref<3x128xf32, #tpu.memory_space<vmem>>, %arg4: memref<8x128xf32, #tpu.memory_space<vmem>>) attributes {dimension_semantics = [#tpu.dimension_semantics<parallel>], iteration_bounds = array<i64: 1>, scalar_prefetch = 0 : i64, scratch_operands = 0 : i64, tpu.core_type = #tpu.core_type<tc>, window_params = [{transform_indices = @transform_0, window_bounds = array<i64: 8, 128>}, {pipeline_mode = #tpu.pipeline_mode<synchronous>, transform_indices = @transform_1, window_bounds = array<i64: 3, 128, 128>}, {pipeline_mode = #tpu.pipeline_mode<synchronous>, transform_indices = @transform_2, window_bounds = array<i64: 3, 128>}, {transform_indices = @transform_3, window_bounds = array<i64: 8, 128>}]} {
    %c0 = arith.constant 0 : index
    %c0_0 = arith.constant 0 : index
    %0 = vector.load %arg1[%c0, %c0_0] : memref<8x128xf32, #tpu.memory_space<vmem>>, vector<8x128xf32>
    %c0_1 = arith.constant 0 : index
    %c0_2 = arith.constant 0 : index
    %c0_3 = arith.constant 0 : index
    %1 = vector.load %arg2[%c0_1, %c0_2, %c0_3] : memref<3x128x128xf32, #tpu.memory_space<vmem>>, vector<1x128x128xf32>
    %2 = vector.shape_cast %1 : vector<1x128x128xf32> to vector<128x128xf32>
    %c0_4 = arith.constant 0 : index
    %c0_5 = arith.constant 0 : index
    %3 = vector.load %arg3[%c0_4, %c0_5] : memref<3x128xf32, #tpu.memory_space<vmem>>, vector<1x128xf32>
    %cst = arith.constant dense<0.000000e+00> : vector<8x128xf32>
    %4 = tpu.matmul %0, %2, %cst {dimension_numbers = #tpu.dot_dimension_numbers<[1], [0], [0], [1], [0, 0, 1, 1], [], []>} : vector<8x128xf32>, vector<128x128xf32>, vector<8x128xf32> -> vector<8x128xf32>
    %5 = vector.broadcast %3 : vector<1x128xf32> to vector<8x128xf32>
    %6 = arith.addf %4, %5 : vector<8x128xf32>
    %cst_6 = arith.constant 0.000000e+00 : f32
    %7 = vector.broadcast %cst_6 : f32 to vector<8x128xf32>
    %8 = arith.maximumf %6, %7 : vector<8x128xf32>
    %c1 = arith.constant 1 : index
    %c0_7 = arith.constant 0 : index
    %c0_8 = arith.constant 0 : index
    %9 = vector.load %arg2[%c1, %c0_7, %c0_8] : memref<3x128x128xf32, #tpu.memory_space<vmem>>, vector<1x128x128xf32>
    %10 = vector.shape_cast %9 : vector<1x128x128xf32> to vector<128x128xf32>
    %c1_9 = arith.constant 1 : index
    %c0_10 = arith.constant 0 : index
    %11 = vector.load %arg3[%c1_9, %c0_10] : memref<3x128xf32, #tpu.memory_space<vmem>>, vector<1x128xf32>
    %cst_11 = arith.constant dense<0.000000e+00> : vector<8x128xf32>
    %12 = tpu.matmul %8, %10, %cst_11 {dimension_numbers = #tpu.dot_dimension_numbers<[1], [0], [0], [1], [0, 0, 1, 1], [], []>} : vector<8x128xf32>, vector<128x128xf32>, vector<8x128xf32> -> vector<8x128xf32>
    %13 = vector.broadcast %11 : vector<1x128xf32> to vector<8x128xf32>
    %14 = arith.addf %12, %13 : vector<8x128xf32>
    %cst_12 = arith.constant 0.000000e+00 : f32
    %15 = vector.broadcast %cst_12 : f32 to vector<8x128xf32>
    %16 = arith.maximumf %14, %15 : vector<8x128xf32>
    %c2 = arith.constant 2 : index
    %c0_13 = arith.constant 0 : index
    %c0_14 = arith.constant 0 : index
    %17 = vector.load %arg2[%c2, %c0_13, %c0_14] : memref<3x128x128xf32, #tpu.memory_space<vmem>>, vector<1x128x128xf32>
    %18 = vector.shape_cast %17 : vector<1x128x128xf32> to vector<128x128xf32>
    %c2_15 = arith.constant 2 : index
    %c0_16 = arith.constant 0 : index
    %19 = vector.load %arg3[%c2_15, %c0_16] : memref<3x128xf32, #tpu.memory_space<vmem>>, vector<1x128xf32>
    %cst_17 = arith.constant dense<0.000000e+00> : vector<8x128xf32>
    %20 = tpu.matmul %16, %18, %cst_17 {dimension_numbers = #tpu.dot_dimension_numbers<[1], [0], [0], [1], [0, 0, 1, 1], [], []>} : vector<8x128xf32>, vector<128x128xf32>, vector<8x128xf32> -> vector<8x128xf32>
    %21 = vector.broadcast %19 : vector<1x128xf32> to vector<8x128xf32>
    %22 = arith.addf %20, %21 : vector<8x128xf32>
    %cst_18 = arith.constant 0.000000e+00 : f32
    %23 = vector.broadcast %cst_18 : f32 to vector<8x128xf32>
    %24 = arith.maximumf %22, %23 : vector<8x128xf32>
    %c0_19 = arith.constant 0 : index
    %c0_20 = arith.constant 0 : index
    %25 = vector.load %arg4[%c0_19, %c0_20] : memref<8x128xf32, #tpu.memory_space<vmem>>, vector<8x128xf32>
    tpu.vector_store %arg4[%c0_19, %c0_20], %24 {strides = array<i32>} : memref<8x128xf32, #tpu.memory_space<vmem>>, vector<8x128xf32>,
    return
  }
  func.func @transform_0(%arg0: i32) -> (i32, i32) {
    %c0_i32 = arith.constant 0 : i32
    %c0_i32_0 = arith.constant 0 : i32
    return %arg0, %c0_i32 : i32, i32
  }
  func.func @transform_1(%arg0: i32) -> (i32, i32, i32) {
    %c0_i32 = arith.constant 0 : i32
    %c0_i32_0 = arith.constant 0 : i32
    %c0_i32_1 = arith.constant 0 : i32
    %c0_i32_2 = arith.constant 0 : i32
    return %c0_i32, %c0_i32_0, %c0_i32_1 : i32, i32, i32
  }
  func.func @transform_2(%arg0: i32) -> (i32, i32) {
    %c0_i32 = arith.constant 0 : i32
    %c0_i32_0 = arith.constant 0 : i32
    %c0_i32_1 = arith.constant 0 : i32
    return %c0_i32, %c0_i32_0 : i32, i32
  }
  func.func @transform_3(%arg0: i32) -> (i32, i32) {
    %c0_i32 = arith.constant 0 : i32
    %c0_i32_0 = arith.constant 0 : i32
    return %arg0, %c0_i32 : i32, i32
  }
}

</mosaic_0001>

<bundles_post_ra>
// kernel: tpu_custom_call.1
= control target key start
LH: loop header
LB: loop body
LE: loop exit
PB: predicated region body
PF: predicated region fallthrough
CT: control target
= control target key end

     0   :  { %8 = vsyncpa [#allocation3], 0  ;;  %s758_s0 = inlined_call_operand.hbm [shape: f32[8,128], index: 0, kind: input, shape index: {}]   ;;  %s759_s1 = inlined_call_operand.hbm [shape: f32[3,128,128], index: 1, kind: input, shape index: {}]   ;;  %s760_s2 = inlined_call_operand.vmem [shape: f32[3,128], index: 2, kind: input, shape index: {}]   ;;  %s761_s3 = inlined_call_operand.hbm [shape: f32[8,128], index: 3, kind: output, shape index: {}]  }
   0x1   :  { %9 = vsyncpa [#allocation6], 0 }
   0x2   :  { %10 = vsyncpa [#allocation4], 0  ;;  %s648_s12 = smov [#allocation2]   ;;  %s649_s14 = smov [#allocation5]  }
   0x3   :  { %s17_s13 = sshll.u32 %s648_s12, 4  ;;  %s26_s15 = sshll.u32 %s649_s14, 4  ;;  %s18_s13 = int_to_ptr.vmem [resolvable:$true] %s17_s13  ;;  %s676_s15 = int_to_ptr.vmem [resolvable:$true] %s26_s15 }
   0x4   :  { %s576_s18 = scalar_lea.hbm %s758_s0, 128 }
   0x5   :  { %p577_p0 = scmp.ne.s32.totalorder %s758_s0, %s576_s18  ;;  %p580_p1 = scmp.lt.u32.totalorder %s576_s18, %s758_s0 }
   0x7   :  { %p582_p2 = pnand %p580_p1, %p577_p0 }
   0x9   :  { %585 = shalt.err (!%p582_p2)
}
   0xa   :  { %s586_s23 = scalar_lea.vmem %s18_s13, 128  ;;  %p591_p4 = scmp.lt.s32.totalorder %s18_s13, %s18_s13 }
   0xb   :  { %p587_p3 = scmp.ne.s32.totalorder %s18_s13, %s586_s23  ;;  %p592_p5 = scmp.lt.s32.totalorder %s586_s23, %s586_s23 }
   0xd   :  { %p593_p6 = por %p592_p5, %p591_p4 }
   0xf   :  { %p594_p7 = pnand %p593_p6, %p587_p3 }
  0x11   :  { %597 = shalt.err (!%p594_p7)
}
  0x12   :  { %20 = dma.hbm_to_vmem [thread:$0]  %s758_s0, 128, %s18_s13, [#allocation3]  }
  0x13   :  { %s598_s28 = scalar_lea.hbm %s759_s1, 6144 }
  0x14   :  { %p599_p8 = scmp.ne.s32.totalorder %s759_s1, %s598_s28  ;;  %p602_p9 = scmp.lt.u32.totalorder %s598_s28, %s759_s1 }
  0x16   :  { %p604_p10 = pnand %p602_p9, %p599_p8 }
  0x18   :  { %607 = shalt.err (!%p604_p10)
}
  0x19   :  { %s608_s6 = scalar_lea.vmem %s676_s15, 6144  ;;  %p613_p12 = scmp.lt.s32.totalorder %s676_s15, %s676_s15 }
  0x1a   :  { %p609_p11 = scmp.ne.s32.totalorder %s676_s15, %s608_s6  ;;  %p614_p13 = scmp.lt.s32.totalorder %s608_s6, %s608_s6 }
  0x1c   :  { %p615_p0 = por %p614_p13, %p613_p12 }
  0x1e   :  { %p616_p1 = pnand %p615_p0, %p609_p11 }
  0x20   :  { %619 = shalt.err (!%p616_p1)
}
  0x21   :  { %s650_s0 = smov 128   ;;  %s651_s7 = smov 8  }
  0x22   :  { %32 = dma.hbm_to_vmem [thread:$0]  %s759_s1, 6144, %s676_s15, [#allocation6], %s650_s0, %s650_s0, %s651_s7  }
  0x23   :  { %642 = dma.done.wait [#allocation3], 128  }
  0x24   :  { %643 = vsyncadd [#allocation3], 4294967168 }
  0x25   :  { %644 = dma.done.wait [#allocation6], 6144  }
  0x26   :  { %645 = vsyncadd [#allocation6], 4294961152  ;;  %v652_v0 = vmov 0.0|0.0   ;;  %vm653_vm0 = vmmov 0   ;;  %v654_v1 = vmov 0.0   ;;  %v42_v2 = vld [vmem:[#allocation5] sm:$0xff] }
  0x27   :  { %496 = vmatprep.subr.bf16.mxu0 %v652_v0  ;;  %423 = vmatprep.mubr.msk.f32.mxu0 %vm653_vm0, %v654_v1  ;;  %v43_v3 = vld [vmem:[#allocation5 + $0x8] sm:$0xff]  ;;  %v44_v4 = vld [vmem:[#allocation5 + $0x10] sm:$0xff]  ;;  %v45_v6 = vld [vmem:[#allocation5 + $0x18] sm:$0xff]  ;;  %s655_s15 = smov [#allocation7]  }
  0x28   :  { %520 = vmatprep.subr.bf16.mxu1 %v652_v0  ;;  %458 = vmatprep.mubr.msk.f32.mxu1 %vm653_vm0, %v654_v1  ;;  %v497_v5 = vpack.c.bf16 %v43_v3, %v42_v2  ;;  %v500_v7 = vpack.c.bf16 %v45_v6, %v44_v4  ;;  %v46_v8 = vld [vmem:[#allocation5 + $0x20] sm:$0xff]  ;;  %v47_v9 = vld [vmem:[#allocation5 + $0x28] sm:$0xff]  ;;  %v137_v12 = vld [vmem:[#allocation5 + $0x90] sm:$0xff]  ;;  %s327_s16 = sshll.u32 %s655_s15, 4  ;;  %s328_s16 = int_to_ptr.vmem [resolvable:$true] %s327_s16 }
  0x29   :  { %v135_v10 = vld [vmem:[#allocation5 + $0x80] sm:$0xff]  ;;  %v136_v11 = vld [vmem:[#allocation5 + $0x88] sm:$0xff]  ;;  %v138_v13 = vld [vmem:[#allocation5 + $0x98] sm:$0xff]  ;;  %v503_v14 = vpack.c.bf16 %v47_v9, %v46_v8  ;;  %s620_s17 = scalar_lea.vmem %s328_s16, 128  ;;  %p625_p3 = scmp.lt.s32.totalorder %s328_s16, %s328_s16 }
  0x2a   :  { %498 = vmatpush3.bf16.msra.mxu0 %v497_v5  ;;  %v521_v15 = vpack.c.bf16 %v136_v11, %v135_v10  ;;  %v48_v16 = vld [vmem:[#allocation5 + $0x30] sm:$0xff]  ;;  %v49_v17 = vld [vmem:[#allocation5 + $0x38] sm:$0xff]  ;;  %v524_v18 = vpack.c.bf16 %v138_v13, %v137_v12  ;;  %v139_v19 = vld [vmem:[#allocation5 + $0xa0] sm:$0xff]  ;;  %p621_p2 = scmp.ne.s32.totalorder %s328_s16, %s620_s17  ;;  %p626_p4 = scmp.lt.s32.totalorder %s620_s17, %s620_s17 }
  0x2b   :  { %499 = vmatprep.subr.bf16.mxu0 %v652_v0  ;;  %v140_v20 = vld [vmem:[#allocation5 + $0xa8] sm:$0xff]  ;;  %v506_v21 = vpack.c.bf16 %v49_v17, %v48_v16  ;;  %v50_v22 = vld [vmem:[#allocation5 + $0x40] sm:$0xff]  ;;  %v141_v25 = vld [vmem:[#allocation5 + $0xb0] sm:$0xff] }
  0x2c   :  { %522 = vmatpush3.bf16.msra.mxu1 %v521_v15  ;;  %v51_v23 = vld [vmem:[#allocation5 + $0x48] sm:$0xff]  ;;  %v527_v24 = vpack.c.bf16 %v140_v20, %v139_v19  ;;  %v142_v26 = vld [vmem:[#allocation5 + $0xb8] sm:$0xff]  ;;  %v52_v28 = vld [vmem:[#allocation5 + $0x50] sm:$0xff]  ;;  %p627_p5 = por %p626_p4, %p625_p3 }
  0x2d   :  { %523 = vmatprep.subr.bf16.mxu1 %v652_v0  ;;  %v509_v27 = vpack.c.bf16 %v51_v23, %v50_v22  ;;  %v53_v29 = vld [vmem:[#allocation5 + $0x58] sm:$0xff]  ;;  %v530_v30 = vpack.c.bf16 %v142_v26, %v141_v25  ;;  %v143_v31 = vld [vmem:[#allocation5 + $0xc0] sm:$0xff]  ;;  %v144_v32 = vld [vmem:[#allocation5 + $0xc8] sm:$0xff] }
  0x2e   :  { %501 = vmatpush3.bf16.msra.mxu0 %v500_v7  ;;  %v512_v33 = vpack.c.bf16 %v53_v29, %v52_v28  ;;  %v54_v34 = vld [vmem:[#allocation5 + $0x60] sm:$0xff]  ;;  %v55_v35 = vld [vmem:[#allocation5 + $0x68] sm:$0xff]  ;;  %v533_v36 = vpack.c.bf16 %v144_v32, %v143_v31  ;;  %v145_v37 = vld [vmem:[#allocation5 + $0xd0] sm:$0xff]  ;;  %p628_p6 = pnand %p627_p5, %p621_p2 }
  0x2f   :  { %502 = vmatprep.subr.bf16.mxu0 %v652_v0  ;;  %v146_v38 = vld [vmem:[#allocation5 + $0xd8] sm:$0xff]  ;;  %v515_v39 = vpack.c.bf16 %v55_v35, %v54_v34  ;;  %v56_v40 = vld [vmem:[#allocation5 + $0x70] sm:$0xff]  ;;  %v147_v43 = vld [vmem:[#allocation5 + $0xe0] sm:$0xff] }
  0x30   :  { %525 = vmatpush3.bf16.msra.mxu1 %v524_v18  ;;  %v57_v41 = vld [vmem:[#allocation5 + $0x78] sm:$0xff]  ;;  %v536_v42 = vpack.c.bf16 %v146_v38, %v145_v37  ;;  %v148_v44 = vld [vmem:[#allocation5 + $0xe8] sm:$0xff]  ;;  %v149_v48 = vld [vmem:[#allocation5 + $0xf0] sm:$0xff] }
  0x31   :  { %526 = vmatprep.subr.bf16.mxu1 %v652_v0  ;;  %v518_v45 = vpack.c.bf16 %v57_v41, %v56_v40  ;;  %v539_v46 = vpack.c.bf16 %v148_v44, %v147_v43  ;;  %v41_v47 = vld [vmem:[#allocation2] sm:$0xff]  ;;  %v228_v51 = vld [vmem:[#allocation5 + $0x100] sm:$0xff]  ;;  %v229_v52 = vld [vmem:[#allocation5 + $0x108] sm:$0xff] }
  0x32   :  { %504 = vmatpush3.bf16.msra.mxu0 %v503_v14  ;;  %v150_v49 = vld [vmem:[#allocation5 + $0xf8] sm:$0xff]  ;;  %v230_v53 = vld [vmem:[#allocation5 + $0x110] sm:$0xff]  ;;  %v545_v54 = vpack.c.bf16 %v229_v52, %v228_v51  ;;  %v232_v57 = vld [vmem:[#allocation5 + $0x120] sm:$0xff] }
  0x33   :  { %505 = vmatprep.subr.bf16.mxu0 %v652_v0  ;;  %v542_v50 = vpack.c.bf16 %v150_v49, %v149_v48  ;;  %v231_v55 = vld [vmem:[#allocation5 + $0x118] sm:$0xff]  ;;  %v233_v58 = vld [vmem:[#allocation5 + $0x128] sm:$0xff]  ;;  %v234_v60 = vld [vmem:[#allocation5 + $0x130] sm:$0xff] }
  0x34   :  { %528 = vmatpush3.bf16.msra.mxu1 %v527_v24  ;;  %v548_v56 = vpack.c.bf16 %v231_v55, %v230_v53  ;;  %v551_v59 = vpack.c.bf16 %v233_v58, %v232_v57  ;;  %v235_v61 = vld [vmem:[#allocation5 + $0x138] sm:$0xff]  ;;  %v236_v63 = vld [vmem:[#allocation5 + $0x140] sm:$0xff]  ;;  %v238_v3 = vld [vmem:[#allocation5 + $0x150] sm:$0xff] }
  0x35   :  { %529 = vmatprep.subr.bf16.mxu1 %v652_v0  ;;  %v554_v62 = vpack.c.bf16 %v235_v61, %v234_v60  ;;  %v239_v4 = vld [vmem:[#allocation5 + $0x158] sm:$0xff]  ;;  %v240_v6 = vld [vmem:[#allocation5 + $0x160] sm:$0xff]  ;;  %v241_v7 = vld [vmem:[#allocation5 + $0x168] sm:$0xff] }
  0x36   :  { %507 = vmatpush3.bf16.msra.mxu0 %v506_v21  ;;  %v560_v5 = vpack.c.bf16 %v239_v4, %v238_v3  ;;  %v563_v8 = vpack.c.bf16 %v241_v7, %v240_v6  ;;  %v337_v9 = vld [vmem:[%s760_s2] ss:$0 sm:$0xff]  ;;  %v242_v14 = vld [vmem:[#allocation5 + $0x170] sm:$0xff]  ;;  %v338_v17 = vld [vmem:[%s760_s2 + $0x1] ss:$0 sm:$0xff] }
  0x37   :  { %508 = vmatprep.subr.bf16.mxu0 %v652_v0  ;;  %v243_v15 = vld [vmem:[#allocation5 + $0x178] sm:$0xff] }
  0x38   :  { %531 = vmatpush3.bf16.msra.mxu1 %v530_v30  ;;  %v566_v16 = vpack.c.bf16 %v243_v15, %v242_v14  ;;  %v339_v21 = vld [vmem:[%s760_s2 + $0x2] ss:$0 sm:$0xff] }
  0x39   :  { %532 = vmatprep.subr.bf16.mxu1 %v652_v0 }
  0x3a   :  { %510 = vmatpush3.bf16.msra.mxu0 %v509_v27 }
  0x3b   :  { %511 = vmatprep.subr.bf16.mxu0 %v652_v0 }
  0x3c   :  { %534 = vmatpush3.bf16.msra.mxu1 %v533_v36 }
  0x3d   :  { %535 = vmatprep.subr.bf16.mxu1 %v652_v0 }
  0x3e   :  { %513 = vmatpush3.bf16.msra.mxu0 %v512_v33 }
  0x3f   :  { %514 = vmatprep.subr.bf16.mxu0 %v652_v0 }
  0x40   :  { %537 = vmatpush3.bf16.msra.mxu1 %v536_v42 }
  0x41   :  { %538 = vmatprep.subr.bf16.mxu1 %v652_v0 }
  0x42   :  { %516 = vmatpush3.bf16.msra.mxu0 %v515_v39 }
  0x43   :  { %517 = vmatprep.subr.bf16.mxu0 %v652_v0 }
  0x44   :  { %540 = vmatpush3.bf16.msra.mxu1 %v539_v46 }
  0x45   :  { %541 = vmatprep.subr.bf16.mxu1 %v652_v0 }
  0x46   :  { %519 = vmatpush3.bf16.msra.mxu0 %v518_v45 }
  0x47   :  { %544 = vmatprep.subr.bf16.mxu0 %v652_v0 }
  0x48   :  { %543 = vmatpush3.bf16.msra.mxu1 %v542_v50 }
  0x49   :  { %424 = vmatmul.mubr.f32.vlgmr.msra.gmra.mrb[0].mxu0 %v41_v47 }
  0x4a   :  { %493 = vmatprep.mubr.msk.f32.mxu0 %vm653_vm0, %v654_v1  ;;  %546 = vmatpush3.bf16.msra.mxu0 %v545_v54  ;;  %v237_v1 = vld [vmem:[#allocation5 + $0x148] sm:$0xff] }
  0x4b   :  { %547 = vmatprep.subr.bf16.mxu0 %v652_v0  ;;  %v557_v2 = vpack.c.bf16 %v237_v1, %v236_v63 }
  0x4e   :  { %549 = vmatpush3.bf16.msra.mxu0 %v548_v56 }
  0x4f   :  { %550 = vmatprep.subr.bf16.mxu0 %v652_v0 }
  0x52   :  { %552 = vmatpush3.bf16.msra.mxu0 %v551_v59 }
  0x53   :  { %553 = vmatprep.subr.bf16.mxu0 %v652_v0 }
  0x56   :  { %555 = vmatpush3.bf16.msra.mxu0 %v554_v62 }
  0x57   :  { %556 = vmatprep.subr.bf16.mxu0 %v652_v0 }
  0x5a   :  { %558 = vmatpush3.bf16.msra.mxu0 %v557_v2 }
  0x5b   :  { %559 = vmatprep.subr.bf16.mxu0 %v652_v0 }
  0x5e   :  { %561 = vmatpush3.bf16.msra.mxu0 %v560_v5 }
  0x5f   :  { %562 = vmatprep.subr.bf16.mxu0 %v652_v0 }
  0x62   :  { %564 = vmatpush3.bf16.msra.mxu0 %v563_v8 }
  0x63   :  { %565 = vmatprep.subr.bf16.mxu0 %v652_v0 }
  0x66   :  { %567 = vmatpush3.bf16.msra.mxu0 %v566_v16 }
 0x11c   :  { %v129_v10 = vpop.f32.mrb[0].mxu0 }
 0x11d   :  { %v130_v11 = vadd.f32 %v337_v9, %v129_v10  ;;  %v425_v12 = vpop.f32.mrb[1].mxu0 }
 0x11f   :  { %v133_v13 = vmax.f32 %v130_v11, 0.0 }
 0x121   :  { %459 = vmatmul.mubr.f32.vlgmr.msra.gmra.mrb[0].mxu1 %v133_v13 }
 0x1f4   :  { %v222_v18 = vpop.f32.mrb[0].mxu1 }
 0x1f5   :  { %v223_v19 = vadd.f32 %v338_v17, %v222_v18  ;;  %v460_v0 = vpop.f32.mrb[1].mxu1 }
 0x1f7   :  { %v226_v20 = vmax.f32 %v223_v19, 0.0 }
 0x1f9   :  { %494 = vmatmul.mubr.f32.vlgmr.msra.gmra.mrb[2].mxu0 %v226_v20 }
 0x2cc   :  { %v315_v22 = vpop.f32.mrb[2].mxu0 }
 0x2cd   :  { %v316_v23 = vadd.f32 %v339_v21, %v315_v22  ;;  %v495_v24 = vpop.f32.mrb[3].mxu0 }
 0x2cf   :  { %v319_v25 = vmax.f32 %v316_v23, 0.0 }
 0x2d1   :  { %320 = vst [vmem:[#allocation7] sm:$0xff] %v319_v25 }
 0x2d2   :  { %631 = shalt.err (!%p628_p6)
}
 0x2d3   :  { %s632_s20 = scalar_lea.hbm %s761_s3, 128 }
 0x2d4   :  { %p633_p7 = scmp.ne.s32.totalorder %s761_s3, %s632_s20  ;;  %p636_p8 = scmp.lt.u32.totalorder %s632_s20, %s761_s3 }
 0x2d6   :  { %p638_p9 = pnand %p636_p8, %p633_p7 }
 0x2d8   :  { %641 = shalt.err (!%p638_p9)
}
 0x2d9   :  { %330 = dma.vmem_to_hbm [thread:$0]  %s328_s16, 128, %s761_s3, [#allocation4]  }
 0x2da   :  { %646 = dma.done.wait [#allocation4], 128  }
 0x2db   :  { %647 = vsyncadd [#allocation4], 4294967168 }
 0x2dc   :  { %334 = vsyncpa [#allocation3], 1 }
 0x2dd   :  { %335 = vsyncpa [#allocation6], 1 }
 0x2de   :  { %336 = vsyncpa [#allocation4], 1 }

</bundles_post_ra>
